<compile_context>
chip_gen: v7x
topology: tpu7x:2x2x1
jax: 0.10.0
libtpu: 0.0.40
codegen_flags: <defaults>
</compile_context>

<pallas_src>
import math

import numpy as np

import jax
import jax.numpy as jnp
from jax import lax
from jax.experimental import pallas as pl
from jax.experimental.pallas import tpu as pltpu


# ----------------------------------------------------------------------------
# small helpers
# ----------------------------------------------------------------------------
_TAPS = [(dy, dx) for dy in (-1, 0, 1) for dx in (-1, 0, 1)]   # t = (dy+1)*3+(dx+1)
_UP_STRIDE = 8          # per-tap sublane stride for the small-Cin up-conv stack


def _full_spec(shape):
    return pl.BlockSpec(shape, lambda *_: (0,) * len(shape))


def _conv_masks(H, W):
    """(9, 1, H*W) float32 validity masks for the 9 taps of a 'same' 3x3 conv."""
    p = np.arange(H * W)
    y, x = p // W, p % W
    rows = []
    for dy, dx in _TAPS:
        m = (y + dy >= 0) & (y + dy < H) & (x + dx >= 0) & (x + dx < W)
        rows.append(m.astype(np.float32))
    return jnp.asarray(np.stack(rows, 0)[:, None, :])


def _detect_roll_like_jnp():
    """Resolve pltpu.roll's rotation convention with a tiny probe kernel so the
    conv tap shifts are direction-proof across versions."""

    def kernel(x_ref, o_ref):
        o_ref[...] = pltpu.roll(x_ref[...], 1, 1)

    x = jnp.broadcast_to(jnp.arange(128, dtype=jnp.float32)[None, :], (8, 128))
    y = pl.pallas_call(
        kernel,
        out_shape=jax.ShapeDtypeStruct((8, 128), jnp.float32),
        in_specs=[_full_spec((8, 128))],
        out_specs=_full_spec((8, 128)),
    )(x)
    v = float(y[0, 0])
    if v == 127.0:
        return True      # jnp.roll convention: out[i] = x[(i - shift) % N]
    if v == 1.0:
        return False     # opposite convention: out[i] = x[(i + shift) % N]
    raise RuntimeError(f"unexpected pltpu.roll behaviour (probe value {v})")


def _tap_shifts(HW, W_img, roll_like_jnp):
    """Static lane-roll amounts so that rolled[:, p] == x[:, p + dy*W + dx]."""
    shifts = []
    for dy, dx in _TAPS:
        d = dy * W_img + dx
        shifts.append(((-d) % HW) if roll_like_jnp else (d % HW))
    return shifts


# ----------------------------------------------------------------------------
# the single fused Pallas kernel (whole unrolled primal-dual loop)
# ----------------------------------------------------------------------------
def _build_fused_forward(D, Hs, Ws, n_primal, n_dual, n_iter, roll_like_jnp):
    HW_i, HW_s = D * D, Hs * Ws
    n_in_p, n_in_d = n_primal + 1, n_dual + 2
    assert n_in_p <= _UP_STRIDE and n_in_d <= _UP_STRIDE
    sh_i = _tap_shifts(HW_i, D, roll_like_jnp)
    sh_s = _tap_shifts(HW_s, Ws, roll_like_jnp)
    inv_i, inv_s = 1.0 / HW_i, 1.0 / HW_s

    def kernel(lam_p_ref, lam_d_ref,
               g_ref, A_ref, AT_ref, mask_i_ref, mask_s_ref,
               d_up_w, d_w1, d_w2, d_dn_w, d_vec,
               p_up_w, p_w1, p_w2, p_dn_w, p_vec,
               out_ref,
               primal_sc, dual_sc, stk_i, stk_s, upstk_i, upstk_s):
        it = pl.program_id(0)

        @pl.when(it == 0)
        def _init():
            # TODO(synk): tomosipo ramp-filtered FBP is not reproduced; a clipped
            # adjoint backprojection is used as the surrogate initializer.
            fbp = jnp.clip(jnp.dot(g_ref[...], A_ref[...],
                                   preferred_element_type=jnp.float32), 0.0, 1.0)
            primal_sc[...] = jnp.broadcast_to(fbp, primal_sc.shape)
            dual_sc[...] = jnp.zeros(dual_sc.shape, dual_sc.dtype)
            # zero the up-conv stacks once: their zero-weight pad rows must not
            # hold stale NaN/Inf VMEM (0 * NaN would poison the contraction).
            upstk_i[...] = jnp.zeros(upstk_i.shape, upstk_i.dtype)
            upstk_s[...] = jnp.zeros(upstk_s.shape, upstk_s.dtype)

        ones_i = jnp.ones((HW_i, 1), jnp.float32)
        ones_s = jnp.ones((HW_s, 1), jnp.float32)

        def inorm(x, ones_col, inv_hw):
            # InstanceNorm2d(affine=False, eps=1e-5); reductions on the MXU.
            mean = jnp.dot(x, ones_col, preferred_element_type=jnp.float32) * inv_hw
            d = x - mean
            var = jnp.dot(d * d, ones_col,
                          preferred_element_type=jnp.float32) * inv_hw
            return d * lax.rsqrt(var + 1e-5)

        def prelu(x, slope):
            return jnp.where(x >= 0.0, x, slope * x)

        def conv32(x, w_ref, bias, stack, mask_ref, shifts):
            # 3x3 'same' conv, Cin=Cout=32, as one (32,288)@(288,HW) bf16 matmul.
            for t in range(9):
                xt = x if shifts[t] == 0 else pltpu.roll(x, shifts[t], 1)
                stack[t * 32:(t + 1) * 32, :] = (xt * mask_ref[t]).astype(jnp.bfloat16)
            return jnp.dot(w_ref[...], stack[...],
                           preferred_element_type=jnp.float32) + bias

        def net_step(state, extras, cin, upstk, stk, mask_ref, shifts,
                     up_w, w1, w2, dn_w, vec_ref, ones_col, inv_hw, n_state):
            vec = vec_ref[...]                                   # (32, 8) slab
            up_b, b1, s1 = vec[:, 0:1], vec[:, 1:2], vec[:, 2:3]
            b2, s2 = vec[:, 3:4], vec[:, 4:5]
            dn_b = vec[0:n_state, 5:6]

            # channel concat assembled into the centre-tap (t=4) block
            off = 4 * _UP_STRIDE
            row = 0
            for piece in [state] + extras:
                n = piece.shape[0]
                upstk[off + row: off + row + n, :] = piece
                row += n
            x0 = upstk[off: off + cin, :]                        # (cin, HW)
            for t in range(9):
                if t == 4:
                    continue
                upstk[t * _UP_STRIDE: t * _UP_STRIDE + cin, :] = (
                    pltpu.roll(x0, shifts[t], 1) * mask_ref[t])
            # 3x3 up conv (f32, K = 9*_UP_STRIDE = 72, zero-padded weight cols)
            r = jnp.dot(up_w[...], upstk[...],
                        preferred_element_type=jnp.float32) + up_b

            def ode_layer(x):
                h = inorm(x, ones_col, inv_hw)
                h = prelu(conv32(h, w1, b1, stk, mask_ref, shifts), s1)
                h = inorm(h, ones_col, inv_hw)
                h = prelu(conv32(h, w2, b2, stk, mask_ref, shifts), s2)
                return h

            # torchdiffeq odeint(t=[0,1], method='rk4') == one 3/8-rule RK4 step
            k1 = ode_layer(r)
            k2 = ode_layer(r + k1 * (1.0 / 3.0))
            k3 = ode_layer(r + (k2 - k1 * (1.0 / 3.0)))
            k4 = ode_layer(r + (k1 - k2 + k3))
            r = r + (k1 + 3.0 * (k2 + k3) + k4) * 0.125

            # 1x1 down conv + residual add
            return state + jnp.dot(dn_w[...], r,
                                   preferred_element_type=jnp.float32) + dn_b

        # ----------------------- dual half-iteration -----------------------
        fp = lam_p_ref[it] * jnp.dot(primal_sc[1:2, :], AT_ref[...],
                                     preferred_element_type=jnp.float32)
        dual = net_step(dual_sc[...], [fp, g_ref[...]], n_in_d,
                        upstk_s, stk_s, mask_s_ref, sh_s,
                        d_up_w, d_w1, d_w2, d_dn_w, d_vec, ones_s, inv_s, n_dual)
        dual_sc[...] = dual

        # ---------------------- primal half-iteration ----------------------
        bp = lam_d_ref[it] * jnp.dot(dual[0:1, :], A_ref[...],
                                     preferred_element_type=jnp.float32)
        primal = net_step(primal_sc[...], [bp], n_in_p,
                          upstk_i, stk_i, mask_i_ref, sh_i,
                          p_up_w, p_w1, p_w2, p_dn_w, p_vec, ones_i, inv_i,
                          n_primal)
        primal_sc[...] = primal

        out_ref[...] = primal[0:1, :]

    def inv(shape):
        z = (0,) * len(shape)
        return pl.BlockSpec(shape, lambda i, _z=z: _z)

    def per_iter(tail):
        z = (0,) * len(tail)
        return pl.BlockSpec((None,) + tuple(tail), lambda i, _z=z: (i,) + _z)

    smem = pl.BlockSpec(memory_space=pltpu.MemorySpace.SMEM)

    in_specs = [
        smem, smem,                                     # lambda_primal, lambda_dual
        inv((1, HW_s)),                                 # sinogram g
        inv((HW_s, HW_i)), inv((HW_i, HW_s)),           # A, A^T (loop-invariant)
        inv((9, 1, HW_i)), inv((9, 1, HW_s)),           # conv boundary masks
        per_iter((32, 9 * _UP_STRIDE)),                 # dual up conv (f32)
        per_iter((32, 288)), per_iter((32, 288)),       # dual ODE convs (bf16)
        per_iter((n_dual, 32)), per_iter((32, 8)),      # dual down conv / slab
        per_iter((32, 9 * _UP_STRIDE)),                 # primal up conv (f32)
        per_iter((32, 288)), per_iter((32, 288)),       # primal ODE convs (bf16)
        per_iter((n_primal, 32)), per_iter((32, 8)),    # primal down conv / slab
    ]

    def net_flops(HW, n_state):
        return (2 * 32 * 9 * _UP_STRIDE * HW + 8 * 2 * 32 * 288 * HW
                + 2 * n_state * 32 * HW + 16 * 2 * 2 * 32 * HW)
    flops = int(n_iter * (net_flops(HW_s, n_dual) + net_flops(HW_i, n_primal)
                          + 4 * HW_s * HW_i) + 2 * HW_s * HW_i)
    weight_bytes = n_iter * 2 * (32 * 9 * _UP_STRIDE * 4 + 2 * 32 * 288 * 2
                                 + 32 * 32 * 4 + 32 * 8 * 4)
    bytes_accessed = int(weight_bytes + 2 * HW_s * HW_i * 4
                         + (9 + 2) * (HW_i + HW_s) * 4)

    return pl.pallas_call(
        kernel,
        out_shape=jax.ShapeDtypeStruct((1, HW_i), jnp.float32),
        grid=(n_iter,),
        in_specs=in_specs,
        out_specs=pl.BlockSpec((1, HW_i), lambda i: (0, 0)),
        scratch_shapes=[
            pltpu.VMEM((n_primal, HW_i), jnp.float32),       # primal state
            pltpu.VMEM((n_dual, HW_s), jnp.float32),         # dual state
            pltpu.VMEM((288, HW_i), jnp.bfloat16),           # ODE-conv stack (img)
            pltpu.VMEM((288, HW_s), jnp.bfloat16),           # ODE-conv stack (sino)
            pltpu.VMEM((9 * _UP_STRIDE, HW_i), jnp.float32),  # up-conv stack (img)
            pltpu.VMEM((9 * _UP_STRIDE, HW_s), jnp.float32),  # up-conv stack (sino)
        ],
        compiler_params=pltpu.CompilerParams(dimension_semantics=("arbitrary",)),
        cost_estimate=pl.CostEstimate(flops=flops,
                                      transcendentals=int(n_iter * 2 * 16 * 32),
                                      bytes_accessed=bytes_accessed),
    )


# ----------------------------------------------------------------------------
# parameter prep (hoisted out of the hot path)
# ----------------------------------------------------------------------------
def _stack_conv3x3(w, stride):
    """(cout, cin, 3, 3) conv weight -> (cout, 9*stride) stacked layout matching
    the in-kernel tap/row order (channels zero-padded to `stride` per tap)."""
    cout, cin = w.shape[0], w.shape[1]
    stk = jnp.transpose(w, (0, 2, 3, 1))                 # (cout, ky, kx, cin)
    if stride > cin:
        stk = jnp.pad(stk, ((0, 0), (0, 0), (0, 0), (0, stride - cin)))
    return stk.reshape(cout, 9 * stride)


def _pack_vec(p, n_state):
    """Lane-dense (32, 8) slab: [up_b, b1, s1, b2, s2, down_b(pad), 0, 0]."""
    pad = jnp.zeros((32,), jnp.float32)
    dn_b = jnp.zeros((32,), jnp.float32).at[:n_state].set(p["down_b"])
    return jnp.stack([p["up_b"], p["b1"], p["s1"], p["b2"], p["s2"],
                      dn_b, pad, pad], axis=1)


def _prep_net(plist, n_state):
    up_w = jnp.stack([_stack_conv3x3(p["up_w"], _UP_STRIDE) for p in plist], 0)
    w1 = jnp.stack([_stack_conv3x3(p["w1"], 32) for p in plist], 0).astype(jnp.bfloat16)
    w2 = jnp.stack([_stack_conv3x3(p["w2"], 32) for p in plist], 0).astype(jnp.bfloat16)
    dn_w = jnp.stack([p["down_w"] for p in plist], 0)
    vec = jnp.stack([_pack_vec(p, n_state) for p in plist], 0)
    return up_w, w1, w2, dn_w, vec


# ----------------------------------------------------------------------------
# network forward (mirrors ContinuousPrimalDualNet.forward)
# ----------------------------------------------------------------------------
def make_forward(A, params, lambdas_primal, lambdas_dual,
                 D, Hs, Ws, n_primal, n_dual):
    HW_i, HW_s = D * D, Hs * Ws
    n_iter = len(params["primal"])
    A = jnp.asarray(A, jnp.float32)               # (HW_s, HW_i) forward projector
    AT = jnp.asarray(A.T)                         # (HW_i, HW_s) adjoint

    roll_like_jnp = _detect_roll_like_jnp()
    mask_i = _conv_masks(D, D)
    mask_s = _conv_masks(Hs, Ws)

    d_up_w, d_w1, d_w2, d_dn_w, d_vec = _prep_net(params["dual"], n_dual)
    p_up_w, p_w1, p_w2, p_dn_w, p_vec = _prep_net(params["primal"], n_primal)
    lam_p = jnp.stack([jnp.reshape(l, ()) for l in lambdas_primal]).astype(jnp.float32)
    lam_d = jnp.stack([jnp.reshape(l, ()) for l in lambdas_dual]).astype(jnp.float32)

    fused = _build_fused_forward(D, Hs, Ws, n_primal, n_dual, n_iter,
                                 roll_like_jnp)

    @jax.jit
    def forward(sinogram):                        # (1, Hs, Ws), like the torch input
        g = sinogram.reshape(1, HW_s).astype(jnp.float32)
        out = fused(lam_p, lam_d, g, A, AT, mask_i, mask_s,
                    d_up_w, d_w1, d_w2, d_dn_w, d_vec,
                    p_up_w, p_w1, p_w2, p_dn_w, p_vec)
        return out.reshape(1, 1, D, D)

    return forward


# ----------------------------------------------------------------------------
# pure-JAX reference (for verification of the fused kernel)
# ----------------------------------------------------------------------------
def reference_forward(A, params, lambdas_primal, lambdas_dual,
                      D, Hs, Ws, n_primal, n_dual, sinogram):
    HP = lax.Precision.HIGHEST
    A = A.astype(jnp.float32)

    def conv3x3(x, w, b):                  # x: (H, W, Cin); w: (cout, cin, 3, 3)
        k = jnp.transpose(w, (2, 3, 1, 0))                    # HWIO
        y = lax.conv_general_dilated(x[None], k, (1, 1), ((1, 1), (1, 1)),
                                     dimension_numbers=("NHWC", "HWIO", "NHWC"),
                                     precision=HP)[0]
        return y + b[None, None, :]

    def inorm(x):
        mean = jnp.mean(x, axis=(0, 1), keepdims=True)
        var = jnp.mean((x - mean) ** 2, axis=(0, 1), keepdims=True)
        return (x - mean) / jnp.sqrt(var + 1e-5)

    def prelu(x, s):
        return jnp.where(x >= 0, x, s[None, None, :] * x)

    def ode_layer(x, p):
        h = inorm(x)
        h = prelu(conv3x3(h, p["w1"], p["b1"]), p["s1"])
        h = inorm(h)
        h = prelu(conv3x3(h, p["w2"], p["b2"]), p["s2"])
        return h

    def ode_block(x, p):
        k1 = ode_layer(x, p)
        k2 = ode_layer(x + k1 / 3.0, p)
        k3 = ode_layer(x + (k2 - k1 / 3.0), p)
        k4 = ode_layer(x + (k1 - k2 + k3), p)
        return x + (k1 + 3.0 * (k2 + k3) + k4) / 8.0

    def net(state, extras, p):
        inp = jnp.concatenate([state] + extras, axis=-1)
        r = conv3x3(inp, p["up_w"], p["up_b"])
        r = ode_block(r, p)
        r = jnp.einsum("hwc,nc->hwn", r, p["down_w"], precision=HP) \
            + p["down_b"][None, None, :]
        return state + r

    g_col = sinogram.reshape(Hs * Ws, 1).astype(jnp.float32)
    g_img = g_col.reshape(Hs, Ws, 1)
    fbp = jnp.clip(jnp.dot(A.T, g_col, precision=HP), 0.0, 1.0)
    primal = jnp.tile(fbp.reshape(D, D, 1), (1, 1, n_primal))
    dual = jnp.zeros((Hs, Ws, n_dual), jnp.float32)
    for i in range(len(params["primal"])):
        fp = lambdas_primal[i] * jnp.dot(A, primal[:, :, 1].reshape(-1, 1),
                                         precision=HP)
        dual = net(dual, [fp.reshape(Hs, Ws, 1), g_img], params["dual"][i])
        bp = lambdas_dual[i] * jnp.dot(A.T, dual[:, :, 0].reshape(-1, 1),
                                       precision=HP)
        primal = net(primal, [bp.reshape(D, D, 1)], params["primal"][i])
    return primal[:, :, 0].reshape(1, 1, D, D)


# ----------------------------------------------------------------------------
# parameter construction (Xavier init, PReLU init=0.0, zero biases)
# ----------------------------------------------------------------------------
def xavier_conv(key, cin, cout, kh, kw):
    fan_in, fan_out = cin * kh * kw, cout * kh * kw
    bound = math.sqrt(6.0 / (fan_in + fan_out))
    w = jax.random.uniform(key, (cout, cin, kh, kw), jnp.float32, -bound, bound)
    return w, jnp.zeros((cout,), jnp.float32)


def init_net(key, in_ch, out_ch):
    k0, k1, k2, k3 = jax.random.split(key, 4)
    up_w, up_b = xavier_conv(k0, in_ch, 32, 3, 3)
    w1, b1 = xavier_conv(k1, 32, 32, 3, 3)
    w2, b2 = xavier_conv(k2, 32, 32, 3, 3)
    dn_w, dn_b = xavier_conv(k3, 32, out_ch, 1, 1)
    return {
        "up_w": up_w, "up_b": up_b,
        "w1": w1, "b1": b1, "s1": jnp.zeros((32,), jnp.float32),
        "w2": w2, "b2": b2, "s2": jnp.zeros((32,), jnp.float32),
        "down_w": dn_w[:, :, 0, 0], "down_b": dn_b,
    }


# ----------------------------------------------------------------------------
# main
# ----------------------------------------------------------------------------
if __name__ == "__main__":
    key = jax.random.PRNGKey(0)
    D = 16                    # input_dimension (image is D x D)
    Hs, Ws = 8, 16            # sinogram: n_angles x n_detectors
    n_primal = n_dual = 5
    n_iterations = 2          # small unroll count for the demo

    k_A, k_phantom, k_params = jax.random.split(key, 3)

    # TODO(synk): the real tomosipo Radon operator depends on vg/pg geometry;
    # a fixed dense matrix surrogate is used for op / adj_op here.
    A = jax.random.normal(k_A, (Hs * Ws, D * D), jnp.float32) / math.sqrt(D * D)

    # operator_norm via power iteration -> step_size -> lambda parameters
    v = jnp.ones((D * D,), jnp.float32)
    for _ in range(50):
        v = A.T @ (A @ v)
        v = v / jnp.linalg.norm(v)
    sigma = jnp.linalg.norm(A @ v)
    step_size = 1.0 / sigma
    lambdas_primal = [step_size for _ in range(n_iterations)]   # 10**log10(s) = s
    lambdas_dual = [step_size for _ in range(n_iterations)]

    kp = jax.random.split(k_params, 2 * n_iterations)
    params = {
        "primal": [init_net(kp[i], n_primal + 1, n_primal)
                   for i in range(n_iterations)],
        "dual": [init_net(kp[n_iterations + i], n_dual + 2, n_dual)
                 for i in range(n_iterations)],
    }

    # synthetic observed sinogram: forward-project a random phantom in [0, 1]
    phantom = jax.random.uniform(k_phantom, (D * D, 1), jnp.float32)
    sinogram = (A @ phantom).reshape(1, Hs, Ws)

    fwd = make_forward(A, params, lambdas_primal, lambdas_dual,
                       D, Hs, Ws, n_primal, n_dual)
    out = fwd(sinogram)
    jax.block_until_ready(out)

    assert out.shape == (1, 1, D, D) and out.dtype == jnp.float32
    assert bool(jnp.all(jnp.isfinite(out)))

    # verify the fused Pallas kernel against a pure-JAX reference; bf16 MXU
    # inputs for the ODE-block convs (perf review) widen the gap vs. the
    # HIGHEST-precision f32 reference — layout / indexing bugs would be O(1).
    ref = reference_forward(A, params, lambdas_primal, lambdas_dual,
                            D, Hs, Ws, n_primal, n_dual, sinogram)
    err = float(jnp.max(jnp.abs(out - ref)))
    tol = 5e-2 * max(1.0, float(jnp.max(jnp.abs(ref))))
    assert err < tol, f"mismatch vs reference: max|diff|={err} (tol={tol})"

    print("KERNEL_OK")
</pallas_src>

<mosaic_0001>
module attributes {stable_mosaic.version = 11 : i64} {
  func.func @kernel(%arg0: memref<8x128xf32, #tpu.memory_space<vmem>>, %arg1: memref<8x128xf32, #tpu.memory_space<vmem>>) attributes {dimension_semantics = [], scalar_prefetch = 0 : i64, scratch_operands = 0 : i64, tpu.core_type = #tpu.core_type<tc>} {
    %c0 = arith.constant 0 : index
    %c0_0 = arith.constant 0 : index
    %0 = vector.load %arg0[%c0, %c0_0] : memref<8x128xf32, #tpu.memory_space<vmem>>, vector<8x128xf32>
    %c1_i32 = arith.constant 1 : i32
    %1 = tpu.dynamic_rotate %0 by %c1_i32 dim 1 : vector<8x128xf32>, i32 -> vector<8x128xf32>
    %c0_1 = arith.constant 0 : index
    %c0_2 = arith.constant 0 : index
    %2 = vector.load %arg1[%c0_1, %c0_2] : memref<8x128xf32, #tpu.memory_space<vmem>>, vector<8x128xf32>
    tpu.vector_store %arg1[%c0_1, %c0_2], %1 {strides = array<i32>} : memref<8x128xf32, #tpu.memory_space<vmem>>, vector<8x128xf32>,
    return
  }
}

</mosaic_0001>

<bundles_post_ra>
// kernel: tpu_custom_call.1
= control target key start
LH: loop header
LB: loop body
LE: loop exit
PB: predicated region body
PF: predicated region fallthrough
CT: control target
= control target key end

     0   :  { %6 = vsyncpa [#allocation3], 0  ;;  %s128_s0 = inlined_call_operand.hbm [shape: f32[8,128], index: 0, kind: input, shape index: {}]   ;;  %s129_s1 = inlined_call_operand.hbm [shape: f32[8,128], index: 1, kind: output, shape index: {}]  }
   0x1   :  { %7 = vsyncpa [#allocation4], 0  ;;  %s91_s6 = smov [#allocation2]   ;;  %s43_s10 = scalar_lea.hbm %s128_s0, 128 }
   0x2   :  { %s14_s7 = sshll.u32 %s91_s6, 4  ;;  %p44_p0 = scmp.ne.s32.totalorder %s128_s0, %s43_s10  ;;  %s15_s7 = int_to_ptr.vmem [resolvable:$true] %s14_s7 }
   0x3   :  { %p47_p1 = scmp.lt.u32.totalorder %s43_s10, %s128_s0 }
   0x5   :  { %p49_p2 = pnand %p47_p1, %p44_p0 }
   0x7   :  { %52 = shalt.err (!%p49_p2)
}
   0x8   :  { %s53_s15 = scalar_lea.vmem %s15_s7, 128  ;;  %p58_p4 = scmp.lt.s32.totalorder %s15_s7, %s15_s7 }
   0x9   :  { %p54_p3 = scmp.ne.s32.totalorder %s15_s7, %s53_s15  ;;  %p59_p5 = scmp.lt.s32.totalorder %s53_s15, %s53_s15 }
   0xb   :  { %p60_p6 = por %p59_p5, %p58_p4 }
   0xd   :  { %p61_p7 = pnand %p60_p6, %p54_p3 }
   0xf   :  { %64 = shalt.err (!%p61_p7)
}
  0x10   :  { %17 = dma.hbm_to_vmem [thread:$0]  %s128_s0, 128, %s15_s7, [#allocation3]  }
  0x11   :  { %87 = dma.done.wait [#allocation3], 128  }
  0x12   :  { %88 = vsyncadd [#allocation3], 4294967168  ;;  %v21_v0 = vld [vmem:[#allocation2] sm:$0xff]  ;;  %s92_s18 = smov 1   ;;  %s93_s19 = smov [#allocation5]  }
  0x13   :  { %22 = vrot.lane.b32.xlu0 %v21_v0, %s92_s18  ;;  %s31_s20 = sshll.u32 %s93_s19, 4  ;;  %s32_s20 = int_to_ptr.vmem [resolvable:$true] %s31_s20 }
  0x14   :  { %s65_s21 = scalar_lea.vmem %s32_s20, 128  ;;  %p70_p9 = scmp.lt.s32.totalorder %s32_s20, %s32_s20 }
  0x15   :  { %p66_p8 = scmp.ne.s32.totalorder %s32_s20, %s65_s21  ;;  %p71_p10 = scmp.lt.s32.totalorder %s65_s21, %s65_s21 }
  0x17   :  { %p72_p11 = por %p71_p10, %p70_p9 }
  0x19   :  { %p73_p12 = pnand %p72_p11, %p66_p8 }
  0x85   :  { %v23_v1 = vpop.permute.xlu0 %22 }
  0x86   :  { %24 = vst [vmem:[#allocation5] sm:$0xff] %v23_v1 }
  0x87   :  { %76 = shalt.err (!%p73_p12)
}
  0x88   :  { %s77_s0 = scalar_lea.hbm %s129_s1, 128 }
  0x89   :  { %p78_p13 = scmp.ne.s32.totalorder %s129_s1, %s77_s0  ;;  %p81_p0 = scmp.lt.u32.totalorder %s77_s0, %s129_s1 }
  0x8b   :  { %p83_p1 = pnand %p81_p0, %p78_p13 }
  0x8d   :  { %86 = shalt.err (!%p83_p1)
}
  0x8e   :  { %34 = dma.vmem_to_hbm [thread:$0]  %s32_s20, 128, %s129_s1, [#allocation4]  }
  0x8f   :  { %89 = dma.done.wait [#allocation4], 128  }
  0x90   :  { %90 = vsyncadd [#allocation4], 4294967168 }
  0x91   :  { %38 = vsyncpa [#allocation3], 1 }
  0x92   :  { %39 = vsyncpa [#allocation4], 1 }

</bundles_post_ra>
